<compile_context>
chip_gen: v7x
topology: tpu7x:2x2x1
jax: 0.10.0
libtpu: 0.0.40
codegen_flags: <defaults>
</compile_context>

<pallas_src>
import jax
import jax.numpy as jnp
from jax.experimental import pallas as pl
from jax.experimental.pallas import tpu as pltpu

BN_EPS = 1e-5


def _round_up(v, m):
    return (v + m - 1) // m * m


def _vmem_budget_bytes():
    """Generation-aware VMEM ceiling (~75% of physical per-core VMEM)."""
    cap = 128 * 1024 * 1024
    try:
        info = pltpu.get_tpu_info()
        cap = int(getattr(info, "vmem_capacity_bytes", cap))
    except Exception:
        pass
    return (cap * 3) // 4


# -----------------------------------------------------------------------------
# Kernel
# -----------------------------------------------------------------------------
def binary_classifier_kernel(x_ref,
                             w1_ref, g1_ref, beta1_ref,
                             w2_ref, g2_ref, beta2_ref,
                             w3_ref, b3_ref,
                             out_ref):
    n = x_ref.shape[0]
    inv_n = jnp.float32(1.0 / n)
    out_dim = out_ref.shape[1]

    def bn_relu_bf16(h, g_ref, beta_ref):
        # One-pass batch statistics: sum and sum-of-squares in a single sweep (f32).
        s = jnp.sum(h, axis=0, keepdims=True)
        sq = jnp.sum(h * h, axis=0, keepdims=True)
        mu = s * inv_n
        var = jnp.maximum(sq * inv_n - mu * mu, 0.0)   # biased var, clamp fp noise
        # Folded BN affine -> 2 VALU ops/elem in the normalize phase (fma + max).
        scale = g_ref[...] * jax.lax.rsqrt(var + BN_EPS)
        shift = beta_ref[...] - mu * scale
        # Return bf16: inter-layer activations stay bf16 in VMEM (MXU-native).
        return jnp.maximum(h * scale + shift, 0.0).astype(jnp.bfloat16)

    # Layer 1: x unpadded (N, in_dim); bf16 operands on MXU, f32 accumulation.
    # Linear bias elided (exactly cancelled by BN mean subtraction).
    h = jnp.dot(x_ref[...].astype(jnp.bfloat16), w1_ref[...],
                preferred_element_type=jnp.float32)            # (N, Hp) f32
    h = bn_relu_bf16(h, g1_ref, beta1_ref)                     # (N, Hp) bf16

    # Layer 2 (bias elided as above).
    h = jnp.dot(h, w2_ref[...], preferred_element_type=jnp.float32)
    h = bn_relu_bf16(h, g2_ref, beta2_ref)

    # Layer 3: lane-dense (N, Op=128) MXU compute; only the real out_dim columns
    # are written back to the narrow HBM output.
    y = jnp.dot(h, w3_ref[...], preferred_element_type=jnp.float32) + b3_ref[...]
    out_ref[...] = y[:, :out_dim]


# -----------------------------------------------------------------------------
# One-time parameter preparation (padding + bf16 cast hoisted out of the call path)
# -----------------------------------------------------------------------------
def prepare_params(params):
    in_dim, hidden = params["w1"].shape
    out_dim = params["w3"].shape[1]
    h_pad = _round_up(hidden, 128)
    o_pad = _round_up(out_dim, 128)

    def pad2(a, rows, cols, dtype):
        a = jnp.asarray(a, dtype)
        return jnp.pad(a, ((0, rows - a.shape[0]), (0, cols - a.shape[1])))

    prepared = dict(
        # b1/b2 intentionally omitted (cancelled by training-mode BatchNorm).
        w1=pad2(params["w1"], in_dim, h_pad, jnp.bfloat16),   # rows unpadded: x stays (N, in_dim)
        g1=pad2(params["g1"], 1, h_pad, jnp.float32),
        beta1=pad2(params["beta1"], 1, h_pad, jnp.float32),
        w2=pad2(params["w2"], h_pad, h_pad, jnp.bfloat16),
        g2=pad2(params["g2"], 1, h_pad, jnp.float32),
        beta2=pad2(params["beta2"], 1, h_pad, jnp.float32),
        w3=pad2(params["w3"], h_pad, o_pad, jnp.bfloat16),
        b3=pad2(params["b3"], 1, o_pad, jnp.float32),
    )
    prepared = jax.tree_util.tree_map(jax.device_put, prepared)
    meta = dict(in_dim=in_dim, hidden=hidden, out_dim=out_dim, h_pad=h_pad, o_pad=o_pad)
    return prepared, meta


# -----------------------------------------------------------------------------
# Per-call wrapper (no per-call padding/casting of parameters)
# -----------------------------------------------------------------------------
def binary_classifier(x, prepared, meta):
    n, in_dim = x.shape
    assert in_dim == meta["in_dim"]
    out_dim, h_pad, o_pad = meta["out_dim"], meta["h_pad"], meta["o_pad"]

    args = (x.astype(jnp.float32),
            prepared["w1"], prepared["g1"], prepared["beta1"],
            prepared["w2"], prepared["g2"], prepared["beta2"],
            prepared["w3"], prepared["b3"])

    # Rough cost model for the XLA scheduler.
    mm_flops = 2 * n * (in_dim * h_pad + h_pad * h_pad + h_pad * o_pad)
    bn_flops = 2 * (5 * n * h_pad)
    in_bytes = sum(int(a.size) * a.dtype.itemsize for a in args)
    out_bytes = n * out_dim * 4
    cost = pl.CostEstimate(flops=int(mm_flops + bn_flops),
                           transcendentals=int(2 * h_pad),       # rsqrt per BN layer
                           bytes_accessed=int(in_bytes + out_bytes))

    # VMEM: operands + f32 matmul slab + bf16 activation slab + lane-dense output slab.
    act_bytes = n * h_pad * 4 + n * h_pad * 2 + n * o_pad * 4
    vmem_limit = min(max(4 * (in_bytes + out_bytes + act_bytes), 16 * 1024 * 1024),
                     _vmem_budget_bytes())

    # Whole problem fits VMEM at these sizes -> single-shot, every operand is a
    # full-array VMEM block.  TODO(synk): gridded 3-phase N-pipeline for large N.
    return pl.pallas_call(
        binary_classifier_kernel,
        out_shape=jax.ShapeDtypeStruct((n, out_dim), jnp.float32),
        in_specs=[pl.BlockSpec(memory_space=pltpu.MemorySpace.VMEM)] * len(args),
        out_specs=pl.BlockSpec(memory_space=pltpu.MemorySpace.VMEM),
        compiler_params=pltpu.CompilerParams(vmem_limit_bytes=int(vmem_limit)),
        cost_estimate=cost,
    )(*args)


# -----------------------------------------------------------------------------
# Synthetic parameters + pure-JAX reference (faithful to the PyTorch module)
# -----------------------------------------------------------------------------
def init_params(key, input_dim, hidden_dim, output_dim):
    ks = jax.random.split(key, 6)

    def linear(kw, kb, fan_in, fan_out):
        bound = 1.0 / jnp.sqrt(fan_in)
        w = jax.random.uniform(kw, (fan_in, fan_out), jnp.float32, -bound, bound)
        b = jax.random.uniform(kb, (1, fan_out), jnp.float32, -bound, bound)
        return w, b

    w1, b1 = linear(ks[0], ks[1], input_dim, hidden_dim)
    w2, b2 = linear(ks[2], ks[3], hidden_dim, hidden_dim)
    w3, b3 = linear(ks[4], ks[5], hidden_dim, output_dim)
    g1 = jnp.ones((1, hidden_dim), jnp.float32)
    beta1 = jnp.zeros((1, hidden_dim), jnp.float32)
    g2 = jnp.ones((1, hidden_dim), jnp.float32)
    beta2 = jnp.zeros((1, hidden_dim), jnp.float32)
    return dict(w1=w1, b1=b1, g1=g1, beta1=beta1,
                w2=w2, b2=b2, g2=g2, beta2=beta2,
                w3=w3, b3=b3)


def reference(x, p):
    """Plain-JAX reference matching the PyTorch module (biases included; training-mode
    BatchNorm with batch stats), bf16 MXU operands / f32 accumulation numerics."""
    def dot_bf16(a, w):
        return jnp.dot(a.astype(jnp.bfloat16), w.astype(jnp.bfloat16),
                       preferred_element_type=jnp.float32)

    h = dot_bf16(x, p["w1"]) + p["b1"]
    mu = jnp.mean(h, axis=0, keepdims=True)
    var = jnp.mean((h - mu) ** 2, axis=0, keepdims=True)
    h = jnp.maximum((h - mu) * jax.lax.rsqrt(var + BN_EPS) * p["g1"] + p["beta1"], 0.0)

    h = dot_bf16(h, p["w2"]) + p["b2"]
    mu = jnp.mean(h, axis=0, keepdims=True)
    var = jnp.mean((h - mu) ** 2, axis=0, keepdims=True)
    h = jnp.maximum((h - mu) * jax.lax.rsqrt(var + BN_EPS) * p["g2"] + p["beta2"], 0.0)

    return dot_bf16(h, p["w3"]) + p["b3"]


if __name__ == "__main__":
    N, INPUT_DIM, HIDDEN_DIM, OUTPUT_DIM = 8, 16, 32, 1

    key = jax.random.PRNGKey(0)
    kx, kp = jax.random.split(key)
    x = jax.random.normal(kx, (N, INPUT_DIM), jnp.float32)
    params = init_params(kp, INPUT_DIM, HIDDEN_DIM, OUTPUT_DIM)

    prepared, meta = prepare_params(params)     # one-time padding / bf16 cast

    score = binary_classifier(x, prepared, meta)
    score = jax.block_until_ready(score)

    ref = reference(x, params)
    assert score.shape == (N, OUTPUT_DIM)
    assert jnp.allclose(score, ref, rtol=2e-3, atol=2e-3), \
        float(jnp.max(jnp.abs(score - ref)))

    print("KERNEL_OK")
</pallas_src>

<mosaic_0001>
module attributes {stable_mosaic.version = 11 : i64} {
  func.func @binary_classifier_kernel(%arg0: memref<8x16xf32, #tpu.memory_space<vmem>>, %arg1: memref<16x128xbf16, #tpu.memory_space<vmem>>, %arg2: memref<1x128xf32, #tpu.memory_space<vmem>>, %arg3: memref<1x128xf32, #tpu.memory_space<vmem>>, %arg4: memref<128x128xbf16, #tpu.memory_space<vmem>>, %arg5: memref<1x128xf32, #tpu.memory_space<vmem>>, %arg6: memref<1x128xf32, #tpu.memory_space<vmem>>, %arg7: memref<128x128xbf16, #tpu.memory_space<vmem>>, %arg8: memref<1x128xf32, #tpu.memory_space<vmem>>, %arg9: memref<8x1xf32, #tpu.memory_space<vmem>>) attributes {dimension_semantics = [], scalar_prefetch = 0 : i64, scratch_operands = 0 : i64, tpu.core_type = #tpu.core_type<tc>} {
    %c0 = arith.constant 0 : index
    %c0_0 = arith.constant 0 : index
    %0 = vector.load %arg0[%c0, %c0_0] : memref<8x16xf32, #tpu.memory_space<vmem>>, vector<8x16xf32>
    %1 = arith.truncf %0 : vector<8x16xf32> to vector<8x16xbf16>
    %c0_1 = arith.constant 0 : index
    %c0_2 = arith.constant 0 : index
    %2 = vector.load %arg1[%c0_1, %c0_2] : memref<16x128xbf16, #tpu.memory_space<vmem>>, vector<16x128xbf16>
    %cst = arith.constant dense<0.000000e+00> : vector<8x128xf32>
    %3 = tpu.matmul %1, %2, %cst {dimension_numbers = #tpu.dot_dimension_numbers<[1], [0], [0], [1], [0, 0, 1, 1], [], []>} : vector<8x16xbf16>, vector<16x128xbf16>, vector<8x128xf32> -> vector<8x128xf32>
    %cst_3 = arith.constant dense<0.000000e+00> : vector<128xf32>
    %4 = vector.multi_reduction <add>, %3, %cst_3 [0] : vector<8x128xf32> to vector<128xf32>
    %5 = vector.shape_cast %4 : vector<128xf32> to vector<1x128xf32>
    %6 = arith.mulf %3, %3 : vector<8x128xf32>
    %cst_4 = arith.constant dense<0.000000e+00> : vector<128xf32>
    %7 = vector.multi_reduction <add>, %6, %cst_4 [0] : vector<8x128xf32> to vector<128xf32>
    %8 = vector.shape_cast %7 : vector<128xf32> to vector<1x128xf32>
    %cst_5 = arith.constant 1.250000e-01 : f32
    %9 = vector.broadcast %cst_5 : f32 to vector<1x128xf32>
    %10 = arith.mulf %5, %9 : vector<1x128xf32>
    %cst_6 = arith.constant 1.250000e-01 : f32
    %11 = vector.broadcast %cst_6 : f32 to vector<1x128xf32>
    %12 = arith.mulf %8, %11 : vector<1x128xf32>
    %13 = arith.mulf %10, %10 : vector<1x128xf32>
    %14 = arith.subf %12, %13 : vector<1x128xf32>
    %cst_7 = arith.constant 0.000000e+00 : f32
    %15 = vector.broadcast %cst_7 : f32 to vector<1x128xf32>
    %16 = arith.maximumf %14, %15 : vector<1x128xf32>
    %c0_8 = arith.constant 0 : index
    %c0_9 = arith.constant 0 : index
    %17 = vector.load %arg2[%c0_8, %c0_9] : memref<1x128xf32, #tpu.memory_space<vmem>>, vector<1x128xf32>
    %cst_10 = arith.constant 9.99999974E-6 : f32
    %18 = vector.broadcast %cst_10 : f32 to vector<1x128xf32>
    %19 = arith.addf %16, %18 : vector<1x128xf32>
    %20 = math.rsqrt %19 : vector<1x128xf32>
    %21 = arith.mulf %17, %20 : vector<1x128xf32>
    %c0_11 = arith.constant 0 : index
    %c0_12 = arith.constant 0 : index
    %22 = vector.load %arg3[%c0_11, %c0_12] : memref<1x128xf32, #tpu.memory_space<vmem>>, vector<1x128xf32>
    %23 = arith.mulf %10, %21 : vector<1x128xf32>
    %24 = arith.subf %22, %23 : vector<1x128xf32>
    %25 = vector.broadcast %21 : vector<1x128xf32> to vector<8x128xf32>
    %26 = arith.mulf %3, %25 : vector<8x128xf32>
    %27 = vector.broadcast %24 : vector<1x128xf32> to vector<8x128xf32>
    %28 = arith.addf %26, %27 : vector<8x128xf32>
    %cst_13 = arith.constant 0.000000e+00 : f32
    %29 = vector.broadcast %cst_13 : f32 to vector<8x128xf32>
    %30 = arith.maximumf %28, %29 : vector<8x128xf32>
    %31 = arith.truncf %30 : vector<8x128xf32> to vector<8x128xbf16>
    %c0_14 = arith.constant 0 : index
    %c0_15 = arith.constant 0 : index
    %32 = vector.load %arg4[%c0_14, %c0_15] : memref<128x128xbf16, #tpu.memory_space<vmem>>, vector<128x128xbf16>
    %cst_16 = arith.constant dense<0.000000e+00> : vector<8x128xf32>
    %33 = tpu.matmul %31, %32, %cst_16 {dimension_numbers = #tpu.dot_dimension_numbers<[1], [0], [0], [1], [0, 0, 1, 1], [], []>} : vector<8x128xbf16>, vector<128x128xbf16>, vector<8x128xf32> -> vector<8x128xf32>
    %cst_17 = arith.constant dense<0.000000e+00> : vector<128xf32>
    %34 = vector.multi_reduction <add>, %33, %cst_17 [0] : vector<8x128xf32> to vector<128xf32>
    %35 = vector.shape_cast %34 : vector<128xf32> to vector<1x128xf32>
    %36 = arith.mulf %33, %33 : vector<8x128xf32>
    %cst_18 = arith.constant dense<0.000000e+00> : vector<128xf32>
    %37 = vector.multi_reduction <add>, %36, %cst_18 [0] : vector<8x128xf32> to vector<128xf32>
    %38 = vector.shape_cast %37 : vector<128xf32> to vector<1x128xf32>
    %cst_19 = arith.constant 1.250000e-01 : f32
    %39 = vector.broadcast %cst_19 : f32 to vector<1x128xf32>
    %40 = arith.mulf %35, %39 : vector<1x128xf32>
    %cst_20 = arith.constant 1.250000e-01 : f32
    %41 = vector.broadcast %cst_20 : f32 to vector<1x128xf32>
    %42 = arith.mulf %38, %41 : vector<1x128xf32>
    %43 = arith.mulf %40, %40 : vector<1x128xf32>
    %44 = arith.subf %42, %43 : vector<1x128xf32>
    %cst_21 = arith.constant 0.000000e+00 : f32
    %45 = vector.broadcast %cst_21 : f32 to vector<1x128xf32>
    %46 = arith.maximumf %44, %45 : vector<1x128xf32>
    %c0_22 = arith.constant 0 : index
    %c0_23 = arith.constant 0 : index
    %47 = vector.load %arg5[%c0_22, %c0_23] : memref<1x128xf32, #tpu.memory_space<vmem>>, vector<1x128xf32>
    %cst_24 = arith.constant 9.99999974E-6 : f32
    %48 = vector.broadcast %cst_24 : f32 to vector<1x128xf32>
    %49 = arith.addf %46, %48 : vector<1x128xf32>
    %50 = math.rsqrt %49 : vector<1x128xf32>
    %51 = arith.mulf %47, %50 : vector<1x128xf32>
    %c0_25 = arith.constant 0 : index
    %c0_26 = arith.constant 0 : index
    %52 = vector.load %arg6[%c0_25, %c0_26] : memref<1x128xf32, #tpu.memory_space<vmem>>, vector<1x128xf32>
    %53 = arith.mulf %40, %51 : vector<1x128xf32>
    %54 = arith.subf %52, %53 : vector<1x128xf32>
    %55 = vector.broadcast %51 : vector<1x128xf32> to vector<8x128xf32>
    %56 = arith.mulf %33, %55 : vector<8x128xf32>
    %57 = vector.broadcast %54 : vector<1x128xf32> to vector<8x128xf32>
    %58 = arith.addf %56, %57 : vector<8x128xf32>
    %cst_27 = arith.constant 0.000000e+00 : f32
    %59 = vector.broadcast %cst_27 : f32 to vector<8x128xf32>
    %60 = arith.maximumf %58, %59 : vector<8x128xf32>
    %61 = arith.truncf %60 : vector<8x128xf32> to vector<8x128xbf16>
    %c0_28 = arith.constant 0 : index
    %c0_29 = arith.constant 0 : index
    %62 = vector.load %arg7[%c0_28, %c0_29] : memref<128x128xbf16, #tpu.memory_space<vmem>>, vector<128x128xbf16>
    %cst_30 = arith.constant dense<0.000000e+00> : vector<8x128xf32>
    %63 = tpu.matmul %61, %62, %cst_30 {dimension_numbers = #tpu.dot_dimension_numbers<[1], [0], [0], [1], [0, 0, 1, 1], [], []>} : vector<8x128xbf16>, vector<128x128xbf16>, vector<8x128xf32> -> vector<8x128xf32>
    %c0_31 = arith.constant 0 : index
    %c0_32 = arith.constant 0 : index
    %64 = vector.load %arg8[%c0_31, %c0_32] : memref<1x128xf32, #tpu.memory_space<vmem>>, vector<1x128xf32>
    %65 = vector.broadcast %64 : vector<1x128xf32> to vector<8x128xf32>
    %66 = arith.addf %63, %65 : vector<8x128xf32>
    %67 = vector.extract_strided_slice %66 {offsets = [0, 0], sizes = [8, 1], strides = [1, 1]} : vector<8x128xf32> to vector<8x1xf32>
    %c0_33 = arith.constant 0 : index
    %c0_34 = arith.constant 0 : index
    %68 = vector.load %arg9[%c0_33, %c0_34] : memref<8x1xf32, #tpu.memory_space<vmem>>, vector<8x1xf32>
    tpu.vector_store %arg9[%c0_33, %c0_34], %67 {strides = array<i32>} : memref<8x1xf32, #tpu.memory_space<vmem>>, vector<8x1xf32>,
    return
  }
}

</mosaic_0001>

<bundles_post_ra>
// kernel: tpu_custom_call.1
= control target key start
LH: loop header
LB: loop body
LE: loop exit
PB: predicated region body
PF: predicated region fallthrough
CT: control target
= control target key end

     0   :  { %14 = vsyncpa [#allocation3], 0  ;;  %s813_s0 = inlined_call_operand.hbm [shape: f32[8,16], index: 0, kind: input, shape index: {}]   ;;  %s814_s1 = inlined_call_operand.hbm [shape: bf16[16,128], index: 1, kind: input, shape index: {}]   ;;  %s815_s2 = inlined_call_operand.vmem [shape: f32[1,128], index: 2, kind: input, shape index: {}]   ;;  %s816_s3 = inlined_call_operand.vmem [shape: f32[1,128], index: 3, kind: input, shape index: {}]   ;;  %s817_s4 = inlined_call_operand.hbm [shape: bf16[128,128], index: 4, kind: input, shape index: {}]   ;;  %s818_s5 = inlined_call_operand.vmem [shape: f32[1,128], index: 5, kind: input, shape index: {}]   ;;  %s819_s6 = inlined_call_operand.vmem [shape: f32[1,128], index: 6, kind: input, shape index: {}]   ;;  %s820_s7 = inlined_call_operand.hbm [shape: bf16[128,128], index: 7, kind: input, shape index: {}]   ;;  %s821_s8 = inlined_call_operand.vmem [shape: f32[1,128], index: 8, kind: input, shape index: {}]   ;;  %s822_s9 = inlined_call_operand.vmem [shape: f32[8,1], index: 9, kind: output, shape index: {}]  }
   0x1   :  { %15 = vsyncpa [#allocation5], 0 }
   0x2   :  { %16 = vsyncpa [#allocation8], 0  ;;  %s654_s30 = smov [#allocation4]   ;;  %s560_s13 = scalar_lea.hbm %s814_s1, 128 }
   0x3   :  { %s32_s10 = sshll.u32 %s654_s30, 4  ;;  %p561_p0 = scmp.ne.s32.totalorder %s814_s1, %s560_s13  ;;  %s33_s10 = int_to_ptr.vmem [resolvable:$true] %s32_s10 }
   0x4   :  { %p564_p1 = scmp.lt.u32.totalorder %s560_s13, %s814_s1 }
   0x6   :  { %p566_p2 = pnand %p564_p1, %p561_p0 }
   0x8   :  { %569 = shalt.err (!%p566_p2)
}
   0x9   :  { %s570_s18 = scalar_lea.vmem %s33_s10, 128  ;;  %p575_p4 = scmp.lt.s32.totalorder %s33_s10, %s33_s10 }
   0xa   :  { %p571_p3 = scmp.ne.s32.totalorder %s33_s10, %s570_s18  ;;  %p576_p5 = scmp.lt.s32.totalorder %s570_s18, %s570_s18 }
   0xc   :  { %p577_p6 = por %p576_p5, %p575_p4 }
   0xe   :  { %p578_p7 = pnand %p577_p6, %p571_p3 }
  0x10   :  { %581 = shalt.err (!%p578_p7)
}
  0x11   :  { %s655_s19 = smov 64   ;;  %s656_s20 = smov 4  }
  0x12   :  { %38 = dma.hbm_to_vmem [thread:$0]  %s814_s1, 128, %s33_s10, [#allocation5], %s655_s19, %s655_s19, %s656_s20  }
  0x13   :  { %s657_s23 = smov [#allocation2]   ;;  %s658_s25 = smov [#allocation6]  }
  0x14   :  { %s23_s24 = sshll.u32 %s657_s23, 4  ;;  %s48_s26 = sshll.u32 %s658_s25, 4  ;;  %s24_s24 = int_to_ptr.vmem [resolvable:$true] %s23_s24  ;;  %s49_s26 = int_to_ptr.vmem [resolvable:$true] %s48_s26 }
  0x15   :  { %s582_s29 = scalar_lea.hbm %s813_s0, 128 }
  0x16   :  { %p583_p8 = scmp.ne.s32.totalorder %s813_s0, %s582_s29  ;;  %p586_p9 = scmp.lt.u32.totalorder %s582_s29, %s813_s0 }
  0x18   :  { %p588_p10 = pnand %p586_p9, %p583_p8 }
  0x1a   :  { %591 = shalt.err (!%p588_p10)
}
  0x1b   :  { %s592_s1 = scalar_lea.vmem %s24_s24, 128  ;;  %p597_p12 = scmp.lt.s32.totalorder %s24_s24, %s24_s24 }
  0x1c   :  { %p593_p11 = scmp.ne.s32.totalorder %s24_s24, %s592_s1  ;;  %p598_p13 = scmp.lt.s32.totalorder %s592_s1, %s592_s1 }
  0x1e   :  { %p599_p0 = por %p598_p13, %p597_p12 }
  0x20   :  { %p600_p1 = pnand %p599_p0, %p593_p11 }
  0x22   :  { %603 = shalt.err (!%p600_p1)
}
  0x23   :  { %26 = dma.hbm_to_vmem [thread:$0]  %s813_s0, 128, %s24_s24, [#allocation3]  }
  0x24   :  { %s604_s17 = scalar_lea.hbm %s817_s4, 1024 }
  0x25   :  { %p605_p2 = scmp.ne.s32.totalorder %s817_s4, %s604_s17  ;;  %p608_p3 = scmp.lt.u32.totalorder %s604_s17, %s817_s4 }
  0x27   :  { %p610_p4 = pnand %p608_p3, %p605_p2 }
  0x29   :  { %613 = shalt.err (!%p610_p4)
}
  0x2a   :  { %s614_s25 = scalar_lea.vmem %s49_s26, 1024  ;;  %p619_p6 = scmp.lt.s32.totalorder %s49_s26, %s49_s26 }
  0x2b   :  { %p615_p5 = scmp.ne.s32.totalorder %s49_s26, %s614_s25  ;;  %p620_p7 = scmp.lt.s32.totalorder %s614_s25, %s614_s25 }
  0x2d   :  { %p621_p8 = por %p620_p7, %p619_p6 }
  0x2f   :  { %p622_p9 = pnand %p621_p8, %p615_p5 }
  0x31   :  { %625 = shalt.err (!%p622_p9)
}
  0x32   :  { %54 = dma.hbm_to_vmem [thread:$0]  %s817_s4, 1024, %s49_s26, [#allocation5], %s655_s19, %s655_s19, %s656_s20  }
  0x33   :  { %s659_s27 = smov [#allocation7]   ;;  %s626_s11 = scalar_lea.hbm %s820_s7, 1024 }
  0x34   :  { %s64_s28 = sshll.u32 %s659_s27, 4  ;;  %p627_p10 = scmp.ne.s32.totalorder %s820_s7, %s626_s11  ;;  %s65_s28 = int_to_ptr.vmem [resolvable:$true] %s64_s28 }
  0x35   :  { %p630_p11 = scmp.lt.u32.totalorder %s626_s11, %s820_s7 }
  0x37   :  { %p632_p12 = pnand %p630_p11, %p627_p10 }
  0x39   :  { %635 = shalt.err (!%p632_p12)
}
  0x3a   :  { %s636_s14 = scalar_lea.vmem %s65_s28, 1024  ;;  %p641_p0 = scmp.lt.s32.totalorder %s65_s28, %s65_s28 }
  0x3b   :  { %p637_p13 = scmp.ne.s32.totalorder %s65_s28, %s636_s14  ;;  %p642_p1 = scmp.lt.s32.totalorder %s636_s14, %s636_s14 }
  0x3d   :  { %p643_p2 = por %p642_p1, %p641_p0 }
  0x3f   :  { %p644_p3 = pnand %p643_p2, %p637_p13 }
  0x41   :  { %647 = shalt.err (!%p644_p3)
}
  0x42   :  { %70 = dma.hbm_to_vmem [thread:$0]  %s820_s7, 1024, %s65_s28, [#allocation8], %s655_s19, %s655_s19, %s656_s20  }
  0x43   :  { %648 = dma.done.wait [#allocation3], 128  }
  0x44   :  { %649 = vsyncadd [#allocation3], 4294967168 }
  0x45   :  { %650 = dma.done.wait [#allocation5], 1152  }
  0x46   :  { %651 = vsyncadd [#allocation5], 4294966144 }
  0x47   :  { %652 = dma.done.wait [#allocation8], 1024  }
  0x48   :  { %653 = vsyncadd [#allocation8], 4294966272  ;;  %v660_v0 = vmov 0.0   ;;  %vm661_vm0 = vmmov 0   ;;  %v539_v1 = vld [vmem:[#allocation4] sm:$0xff]   ;;  %v86_v2 = vld [vmem:[#allocation2] sm:$0xff]  ;;  %v166_v35 = vlaneseq }
  0x49   :  { %485 = vmatprep.subr.bf16.mxu0 %v660_v0  ;;  %487 = vmatprep.mubr.msk.bf16.mxu0 %vm661_vm0, %v660_v0  ;;  %vm96_vm1 = vcmask 130048   ;;  %v87_v3 = vpack.c.bf16 %v86_v2, %v86_v2  ;;  %v540_v4 = vld [vmem:[#allocation6] sm:$0xff]   ;;  %v541_v5 = vld [vmem:[#allocation6 + $0x8] sm:$0xff]   ;;  %v542_v6 = vld [vmem:[#allocation6 + $0x10] sm:$0xff]   ;;  %vm437_vm2 = vcmask 7168  }
  0x4a   :  { %491 = vmatprep.subr.bf16.mxu1 %v660_v0  ;;  %507 = vmatprep.mubr.msk.bf16.mxu1 %vm661_vm0, %v660_v0  ;;  %v543_v7 = vld [vmem:[#allocation6 + $0x18] sm:$0xff]   ;;  %v544_v8 = vld [vmem:[#allocation6 + $0x20] sm:$0xff]   ;;  %v545_v9 = vld [vmem:[#allocation6 + $0x28] sm:$0xff]   ;;  %v167_v36 = vshrl.u32 %v166_v35, 7 }
  0x4b   :  { %486 = vmatpush3.bf16.msra.mxu0 %v539_v1  ;;  %492 = vmatpush3.bf16.msra.mxu1 %v540_v4  ;;  %v546_v10 = vld [vmem:[#allocation6 + $0x30] sm:$0xff]   ;;  %v547_v11 = vld [vmem:[#allocation6 + $0x38] sm:$0xff]   ;;  %v158_v37 = vld [vmem:[%s815_s2] sm:$0x1] }
  0x4c   :  { %511 = vmatprep.subr.bf16.mxu0 %v660_v0  ;;  %493 = vmatprep.subr.bf16.mxu1 %v660_v0  ;;  %v785_v38 = vsub.s32 0, %v167_v36  ;;  %v162_v41 = vld [vmem:[%s816_s3] sm:$0x1]  ;;  %v548_v50 = vld [vmem:[#allocation7] sm:$0xff]   ;;  %v550_v52 = vld [vmem:[#allocation7 + $0x10] sm:$0xff]  }
  0x4d   :  { %v549_v51 = vld [vmem:[#allocation7 + $0x8] sm:$0xff]   ;;  %v551_v53 = vld [vmem:[#allocation7 + $0x18] sm:$0xff]   ;;  %v552_v54 = vld [vmem:[#allocation7 + $0x20] sm:$0xff]  }
  0x4e   :  { %488 = vmatmul.mubr.msk.bf16.vlgmr.msra.gmra.mrb[0].mxu0 %vm96_vm1, %v87_v3  ;;  %v553_v55 = vld [vmem:[#allocation7 + $0x28] sm:$0xff]   ;;  %v554_v56 = vld [vmem:[#allocation7 + $0x30] sm:$0xff]   ;;  %v555_v57 = vld [vmem:[#allocation7 + $0x38] sm:$0xff]  }
  0x4f   :  { %527 = vmatprep.mubr.msk.bf16.mxu0 %vm661_vm0, %v660_v0  ;;  %494 = vmatpush3.bf16.msra.mxu1 %v541_v5 }
  0x50   :  { %495 = vmatprep.subr.bf16.mxu1 %v660_v0  ;;  %512 = vmatpush3.bf16.msra.mxu0 %v548_v50 }
  0x51   :  { %513 = vmatprep.subr.bf16.mxu0 %v660_v0 }
  0x53   :  { %496 = vmatpush3.bf16.msra.mxu1 %v542_v6 }
  0x54   :  { %497 = vmatprep.subr.bf16.mxu1 %v660_v0  ;;  %514 = vmatpush3.bf16.msra.mxu0 %v549_v51 }
  0x55   :  { %515 = vmatprep.subr.bf16.mxu0 %v660_v0 }
  0x57   :  { %498 = vmatpush3.bf16.msra.mxu1 %v543_v7 }
  0x58   :  { %499 = vmatprep.subr.bf16.mxu1 %v660_v0  ;;  %516 = vmatpush3.bf16.msra.mxu0 %v550_v52 }
  0x59   :  { %517 = vmatprep.subr.bf16.mxu0 %v660_v0 }
  0x5b   :  { %500 = vmatpush3.bf16.msra.mxu1 %v544_v8 }
  0x5c   :  { %501 = vmatprep.subr.bf16.mxu1 %v660_v0  ;;  %518 = vmatpush3.bf16.msra.mxu0 %v551_v53 }
  0x5d   :  { %519 = vmatprep.subr.bf16.mxu0 %v660_v0 }
  0x5f   :  { %502 = vmatpush3.bf16.msra.mxu1 %v545_v9 }
  0x60   :  { %503 = vmatprep.subr.bf16.mxu1 %v660_v0  ;;  %520 = vmatpush3.bf16.msra.mxu0 %v552_v54 }
  0x61   :  { %521 = vmatprep.subr.bf16.mxu0 %v660_v0 }
  0x63   :  { %504 = vmatpush3.bf16.msra.mxu1 %v546_v10 }
  0x64   :  { %505 = vmatprep.subr.bf16.mxu1 %v660_v0  ;;  %522 = vmatpush3.bf16.msra.mxu0 %v553_v55 }
  0x65   :  { %523 = vmatprep.subr.bf16.mxu0 %v660_v0 }
  0x67   :  { %506 = vmatpush3.bf16.msra.mxu1 %v547_v11 }
  0x68   :  { %524 = vmatpush3.bf16.msra.mxu0 %v554_v56 }
  0x69   :  { %525 = vmatprep.subr.bf16.mxu0 %v660_v0 }
  0x6c   :  { %526 = vmatpush3.bf16.msra.mxu0 %v555_v57 }
 0x121   :  { %v134_v12 = vpop.f32.mrb[0].mxu0 }
 0x122   :  { %v140_v13 = vrot.slane %v134_v12, 4  ;;  %v146_v14 = vmul.f32 %v134_v12, %v134_v12  ;;  %v489_v15 = vpop.f32.mrb[1].mxu0 }
 0x123   :  { %v137_v16 = vpop.f32.mrb[2].mxu0 }
 0x124   :  { %v141_v17 = vadd.f32 %v140_v13, %v134_v12  ;;  %v147_v18 = vrot.slane %v146_v14, 4  ;;  %v490_v19 = vpop.f32.mrb[3].mxu0 }
 0x126   :  { %v142_v20 = vrot.slane %v141_v17, 2  ;;  %v148_v21 = vadd.f32 %v147_v18, %v146_v14 }
 0x128   :  { %v143_v22 = vadd.f32 %v142_v20, %v141_v17  ;;  %v149_v23 = vrot.slane %v148_v21, 2  ;;  %v303_v17 = vld [vmem:[%s818_s5] sm:$0x1] }
 0x129   :  { %v307_v20 = vld [vmem:[%s819_s6] sm:$0x1] }
 0x12a   :  { %v144_v24 = vrot.slane %v143_v22, 1  ;;  %v150_v25 = vadd.f32 %v149_v23, %v148_v21 }
 0x12c   :  { %v145_v26 = vadd.f32 %v144_v24, %v143_v22  ;;  %v151_v27 = vrot.slane %v150_v25, 1 }
 0x12e   :  { %v152_v28 = vadd.f32 %v151_v27, %v150_v25  ;;  %v153_v29 = vmul.f32 0.125, %v145_v26 }
 0x130   :  { %v154_v30 = vmul.f32 0.125, %v152_v28  ;;  %v155_v31 = vmul.f32 %v153_v29, %v153_v29 }
 0x132   :  { %v156_v32 = vsub.f32 %v154_v30, %v155_v31 }
 0x134   :  { %v157_v33 = vmax.f32 %v156_v32, 0.0 }
 0x136   :  { %v159_v34 = vadd.f32 1e-05, %v157_v33 }
 0x138   :  { %556 = vrsqrt.f32 %v159_v34 }
 0x142   :  { %v557_v39 = vpop.eup %556 }
 0x143   :  { %v161_v40 = vmul.f32 %v557_v39, %v158_v37 }
 0x145   :  { %v169_v42 = vrot.slane %v161_v40, %v785_v38  ;;  %v163_v43 = vmul.f32 %v161_v40, %v153_v29  ;;  %v456_v29 = vld [vmem:[%s821_s8] ss:$0 sm:$0xff] }
 0x147   :  { %v164_v44 = vsub.f32 %v162_v41, %v163_v43  ;;  %v171_v45 = vmul.f32 %v169_v42, %v134_v12 }
 0x149   :  { %v176_v46 = vrot.slane %v164_v44, %v785_v38 }
 0x14b   :  { %v178_v47 = vadd.f32 %v176_v46, %v171_v45 }
 0x14d   :  { %v179_v48 = vmax.f32 %v178_v47, 0.0 }
 0x14f   :  { %v180_v49 = vpack.c.bf16 %v179_v48, %v179_v48 }
 0x151   :  { %508 = vmatmul.mubr.bf16.vlgmr.msra.gmra.mrb[0].mxu1 %v180_v49 }
 0x224   :  { %v279_v58 = vpop.f32.mrb[0].mxu1 }
 0x225   :  { %v285_v59 = vrot.slane %v279_v58, 4  ;;  %v291_v60 = vmul.f32 %v279_v58, %v279_v58  ;;  %v509_v61 = vpop.f32.mrb[1].mxu1 }
 0x226   :  { %v282_v62 = vpop.f32.mrb[2].mxu1 }
 0x227   :  { %v286_v63 = vadd.f32 %v285_v59, %v279_v58  ;;  %v292_v1 = vrot.slane %v291_v60, 4  ;;  %v510_v2 = vpop.f32.mrb[3].mxu1 }
 0x229   :  { %v287_v3 = vrot.slane %v286_v63, 2  ;;  %v293_v4 = vadd.f32 %v292_v1, %v291_v60 }
 0x22b   :  { %v288_v5 = vadd.f32 %v287_v3, %v286_v63  ;;  %v294_v6 = vrot.slane %v293_v4, 2 }
 0x22d   :  { %v289_v7 = vrot.slane %v288_v5, 1  ;;  %v295_v8 = vadd.f32 %v294_v6, %v293_v4 }
 0x22f   :  { %v290_v9 = vadd.f32 %v289_v7, %v288_v5  ;;  %v296_v10 = vrot.slane %v295_v8, 1 }
 0x231   :  { %v297_v11 = vadd.f32 %v296_v10, %v295_v8  ;;  %v298_v0 = vmul.f32 0.125, %v290_v9 }
 0x233   :  { %v299_v12 = vmul.f32 0.125, %v297_v11  ;;  %v300_v13 = vmul.f32 %v298_v0, %v298_v0 }
 0x235   :  { %v301_v14 = vsub.f32 %v299_v12, %v300_v13 }
 0x237   :  { %v302_v15 = vmax.f32 %v301_v14, 0.0 }
 0x239   :  { %v304_v16 = vadd.f32 1e-05, %v302_v15 }
 0x23b   :  { %558 = vrsqrt.f32 %v304_v16 }
 0x245   :  { %v559_v18 = vpop.eup %558 }
 0x246   :  { %v306_v19 = vmul.f32 %v559_v18, %v303_v17 }
 0x248   :  { %v308_v21 = vmul.f32 %v306_v19, %v298_v0  ;;  %v314_v22 = vrot.slane %v306_v19, %v785_v38 }
 0x24a   :  { %v309_v23 = vsub.f32 %v307_v20, %v308_v21  ;;  %v316_v24 = vmul.f32 %v314_v22, %v279_v58 }
 0x24c   :  { %v321_v25 = vrot.slane %v309_v23, %v785_v38 }
 0x24e   :  { %v323_v26 = vadd.f32 %v321_v25, %v316_v24 }
 0x250   :  { %v324_v27 = vmax.f32 %v323_v26, 0.0 }
 0x252   :  { %v325_v28 = vpack.c.bf16 %v324_v27, %v324_v27 }
 0x254   :  { %528 = vmatmul.mubr.bf16.vlgmr.msra.gmra.mrb[4].mxu0 %v325_v28 }
 0x327   :  { %v431_v30 = vpop.f32.mrb[4].mxu0 }
 0x328   :  { %v432_v31 = vadd.f32 %v456_v29, %v431_v30  ;;  %v529_v32 = vpop.f32.mrb[5].mxu0 }
 0x329   :  { %v434_v33 = vpop.f32.mrb[6].mxu0 }
 0x32a   :  { %438 = vst.msk [vmem:[%s822_s9] sm:$0xff] %vm437_vm2, %v432_v31  ;;  %v530_v34 = vpop.f32.mrb[7].mxu0 }
 0x32b   :  { %443 = vsyncpa [#allocation3], 1 }
 0x32c   :  { %444 = vsyncpa [#allocation5], 1 }
 0x32d   :  { %445 = vsyncpa [#allocation8], 1 }

</bundles_post_ra>
